<compile_context>
chip_gen: v7x
topology: tpu7x:2x2x1
jax: 0.10.0
libtpu: 0.0.40
codegen_flags: <defaults>
</compile_context>

<pallas_src>
import functools

import jax
import jax.numpy as jnp
import numpy as np
from jax.experimental import pallas as pl
from jax.experimental.pallas import tpu as pltpu


# ---------------------------------------------------------------------------
# Kernel
# ---------------------------------------------------------------------------
def attention_kernel(enc_ref, dec_ref, we_ref, wd_ref, bias_ref, wf_ref,
                     awe_ref, alpha_ref, *, p_valid, lane_chunk):
    # enc_ref  : (TB, Pp, E) bf16     dec_ref  : (TB, D)  bf16
    # we_ref   : (E, Ap)     bf16     wd_ref   : (D, Ap)  bf16
    # bias_ref : (1, Ap)     f32      wf_ref   : (1, Ap)  f32
    # awe_ref  : (TB, E)     f32      alpha_ref: (TB, Pa) f32
    TB, Pp, E = enc_ref.shape
    Ap = we_ref.shape[1]
    Pa = alpha_ref.shape[1]

    enc = enc_ref[...]                                  # (TB, Pp, E) bf16
    enc2d = enc.reshape(TB * Pp, E)                     # free view (Pp % 8 == 0)
    dec = dec_ref[...]                                  # (TB, D)     bf16

    # Scores: loop over <=256-lane chunks of the attention dim so the f32
    # "h" intermediate stays bounded; MXU matmuls accumulate in f32.
    att = jnp.zeros((TB, Pp), jnp.float32)
    for c0 in range(0, Ap, lane_chunk):
        w_e = we_ref[:, c0:c0 + lane_chunk]             # (E, C) bf16
        w_d = wd_ref[:, c0:c0 + lane_chunk]             # (D, C) bf16
        a1 = jnp.dot(enc2d, w_e,
                     preferred_element_type=jnp.float32)   # (TB*Pp, C) MXU
        a2 = jnp.dot(dec, w_d,
                     preferred_element_type=jnp.float32)   # (TB, C)    MXU
        h = jnp.maximum(a1.reshape(TB, Pp, lane_chunk)
                        + a2[:, None, :]
                        + bias_ref[:, c0:c0 + lane_chunk], 0.0)
        # full_att weight on the VPU + lane reduce (b_full is a constant shift
        # over pixels and cancels in the softmax, so it is dropped).
        att = att + jnp.sum(h * wf_ref[:, c0:c0 + lane_chunk], axis=-1)

    # Mask pixel padding, then softmax over the pixel (lane) axis.
    if p_valid < Pp:
        col = jax.lax.broadcasted_iota(jnp.int32, (TB, Pp), 1)
        att = jnp.where(col < p_valid, att, -1e30)

    m = jnp.max(att, axis=-1, keepdims=True)
    e = jnp.exp(att - m)
    s = jnp.sum(e, axis=-1, keepdims=True)
    r = pl.reciprocal(s, approx=True)                   # EUP slot, ~free
    r = r * (2.0 - s * r)                               # one Newton step
    alpha = e * r                                       # (TB, Pp) f32

    if Pa > Pp:                                         # lane-dense alpha store
        alpha_out = jnp.concatenate(
            [alpha, jnp.zeros((TB, Pa - Pp), jnp.float32)], axis=-1)
    else:
        alpha_out = alpha
    alpha_ref[...] = alpha_out                          # single unmasked store

    # attention-weighted encoding: sum_p alpha[b, p] * enc[b, p, :]   (f32)
    awe_ref[...] = jnp.sum(enc * alpha[..., None], axis=1)


# ---------------------------------------------------------------------------
# Parameter prep (runs ONCE, outside the per-call path)
# ---------------------------------------------------------------------------
def prepare_params(params):
    """Transpose weights to (in, out), cast MXU operands to bf16, pad the
    attention dim to a multiple of 128 lanes, fuse b_enc + b_dec, and drop
    b_full (a constant added to every score cancels in the softmax)."""
    A, E = params["w_enc"].shape
    D = params["w_dec"].shape[1]
    Ap = ((A + 127) // 128) * 128

    we_t = jnp.zeros((E, Ap), jnp.bfloat16).at[:, :A].set(
        params["w_enc"].T.astype(jnp.bfloat16))
    wd_t = jnp.zeros((D, Ap), jnp.bfloat16).at[:, :A].set(
        params["w_dec"].T.astype(jnp.bfloat16))
    bias = jnp.zeros((1, Ap), jnp.float32).at[0, :A].set(
        (params["b_enc"] + params["b_dec"]).astype(jnp.float32))
    wf_row = jnp.zeros((1, Ap), jnp.float32).at[0, :A].set(
        params["w_full"][0].astype(jnp.float32))
    return {"we_t": we_t, "wd_t": wd_t, "bias": bias, "wf_row": wf_row}


# ---------------------------------------------------------------------------
# Tiling heuristics
# ---------------------------------------------------------------------------
def _tpu_generation_info():
    """(mxu_row_target, vmem_limit_bytes); conservative if unidentifiable."""
    kind = ""
    try:
        kind = jax.devices()[0].device_kind.lower()
    except Exception:
        pass
    vmem_cap = None
    try:
        vmem_cap = int(pltpu.get_tpu_info().vmem_capacity_bytes)
    except Exception:
        pass
    mxu_rows = 128 if ("v4" in kind or "v5" in kind) else 256   # v6e/v7x: 2x256^2
    if vmem_cap is None:
        if "7" in kind:
            vmem_cap = 64 << 20                                  # v7x per-TC
        elif any(g in kind for g in ("v4", "v5", "v6")):
            vmem_cap = 128 << 20
        else:
            vmem_cap = 64 << 20                                  # unknown: smallest
    vmem_limit = int(min(vmem_cap - (8 << 20), 112 << 20))
    return mxu_rows, vmem_limit


def _pick_batch_tile(B, Pp, E, enc_elem_bytes, vmem_budget_bytes, target_rows):
    """Largest 8-aligned TB s.t. TB*Pp reaches the MXU row target, the
    double-buffered (TB, Pp, E) encoder block fits a slice of the VMEM budget,
    and the grid keeps >= 2 steps when the batch allows it."""
    if B <= 8:
        return B                                     # tiny batch: one block
    tb_rows = -(-target_rows // max(Pp, 1))          # ceil(target / Pp)
    row_bytes = Pp * E * enc_elem_bytes
    tb_vmem = max(1, int(0.4 * vmem_budget_bytes) // (2 * row_bytes))
    tb = max(8, min(tb_rows, tb_vmem))
    tb = min(tb, max(8, B // 2))                     # >= 2 grid steps
    tb = max(8, (tb // 8) * 8)                       # (8,128) rule on 2-D blocks
    return min(tb, B)


# ---------------------------------------------------------------------------
# Forward wrapper
# ---------------------------------------------------------------------------
def attention_forward(encoder_out, decoder_hidden, prep):
    """encoder_out: (B, P, E), decoder_hidden: (B, D).
    Returns (attention_weighted_encoding (B, E) f32, alpha (B, P) f32)."""
    B, P, E = encoder_out.shape
    D = decoder_hidden.shape[1]
    Ap = prep["we_t"].shape[1]

    mxu_rows, vmem_limit = _tpu_generation_info()

    # bf16 MXU operands (halves enc DMA bytes, native MXU rate); pixel axis
    # padded to a multiple of 8 so in-kernel reshapes are free views.
    enc = encoder_out.astype(jnp.bfloat16)
    dec = decoder_hidden.astype(jnp.bfloat16)
    Pp = ((P + 7) // 8) * 8
    if Pp != P:
        enc = jnp.pad(enc, ((0, 0), (0, Pp - P), (0, 0)))

    TB = _pick_batch_tile(B, Pp, E, enc.dtype.itemsize, vmem_limit, mxu_rows)
    Bp = pl.cdiv(B, TB) * TB
    if Bp != B:                                      # pad batch so TB divides it
        enc = jnp.pad(enc, ((0, Bp - B), (0, 0), (0, 0)))
        dec = jnp.pad(dec, ((0, Bp - B), (0, 0)))

    lane_chunk = 256 if Ap % 256 == 0 else 128
    lane_chunk = min(lane_chunk, Ap)

    kernel = functools.partial(attention_kernel, p_valid=P, lane_chunk=lane_chunk)

    cost = pl.CostEstimate(
        flops=int(2 * Bp * Pp * E * Ap + 2 * Bp * D * Ap + 2 * Bp * Pp * E),
        transcendentals=int(Bp * Pp),
        bytes_accessed=int(enc.size * 2 + dec.size * 2
                           + prep["we_t"].size * 2 + prep["wd_t"].size * 2
                           + prep["bias"].size * 4 + prep["wf_row"].size * 4
                           + Bp * E * 4 + Bp * P * 4),
    )

    def build_and_call(lane_dense_alpha, single_buffer_consts):
        Pa = ((Pp + 127) // 128) * 128 if lane_dense_alpha else Pp
        const_kwargs = ({"pipeline_mode": pl.Buffered(1)}
                        if single_buffer_consts else {})

        def const_spec(shape):
            return pl.BlockSpec(shape, lambda b: (0,) * len(shape), **const_kwargs)

        grid_spec = pltpu.PrefetchScalarGridSpec(
            num_scalar_prefetch=0,
            grid=(Bp // TB,),
            in_specs=[
                pl.BlockSpec((TB, Pp, E), lambda b: (b, 0, 0)),   # encoder block
                pl.BlockSpec((TB, D), lambda b: (b, 0)),          # decoder hidden
                const_spec((E, Ap)),                              # W_enc^T (bf16)
                const_spec((D, Ap)),                              # W_dec^T (bf16)
                const_spec((1, Ap)),                              # b_enc + b_dec
                const_spec((1, Ap)),                              # W_full row
            ],
            out_specs=[
                pl.BlockSpec((TB, E), lambda b: (b, 0)),          # weighted enc
                pl.BlockSpec((TB, Pa), lambda b: (b, 0)),         # alpha
            ],
        )
        return pl.pallas_call(
            kernel,
            out_shape=(
                jax.ShapeDtypeStruct((Bp, E), jnp.float32),
                jax.ShapeDtypeStruct((Bp, Pa), jnp.float32),
            ),
            grid_spec=grid_spec,
            compiler_params=pltpu.CompilerParams(
                dimension_semantics=("parallel",),
                vmem_limit_bytes=vmem_limit),
            cost_estimate=cost,
        )(enc, dec, prep["we_t"], prep["wd_t"], prep["bias"], prep["wf_row"])

    try:
        awe, alpha = build_and_call(lane_dense_alpha=True, single_buffer_consts=True)
    except Exception:
        # Conservative fallback: default double-buffering, un-padded alpha.
        awe, alpha = build_and_call(lane_dense_alpha=False, single_buffer_consts=False)

    return awe[:B], alpha[:B, :P]


# ---------------------------------------------------------------------------
# Pure-JAX reference (mirrors the PyTorch module; mxu_dtype=bf16 mirrors the
# kernel's mixed precision — bf16 MXU operands, f32 accumulation).
# ---------------------------------------------------------------------------
def attention_reference(encoder_out, decoder_hidden, params, mxu_dtype=jnp.float32):
    enc = encoder_out.astype(mxu_dtype)
    dec = decoder_hidden.astype(mxu_dtype)
    we = params["w_enc"].astype(mxu_dtype)
    wd = params["w_dec"].astype(mxu_dtype)
    att1 = jnp.einsum("bpe,ae->bpa", enc, we,
                      preferred_element_type=jnp.float32) + params["b_enc"]
    att2 = jnp.einsum("bd,ad->ba", dec, wd,
                      preferred_element_type=jnp.float32) + params["b_dec"]
    h = jnp.maximum(att1 + att2[:, None, :], 0.0)
    att = h @ params["w_full"][0] + params["b_full"][0]            # (B, P)
    alpha = jax.nn.softmax(att, axis=1)
    awe = jnp.sum(enc.astype(jnp.float32) * alpha[..., None], axis=1)
    return awe, alpha


if __name__ == "__main__":
    B, P, E, D, A = 2, 8, 32, 32, 32   # batch, num_pixels, enc/dec/attn dims

    key = jax.random.PRNGKey(0)
    k = jax.random.split(key, 8)
    params = {
        "w_enc":  jax.random.normal(k[0], (A, E), jnp.float32) * 0.1,
        "b_enc":  jax.random.normal(k[1], (A,),   jnp.float32) * 0.1,
        "w_dec":  jax.random.normal(k[2], (A, D), jnp.float32) * 0.1,
        "b_dec":  jax.random.normal(k[3], (A,),   jnp.float32) * 0.1,
        "w_full": jax.random.normal(k[4], (1, A), jnp.float32) * 0.1,
        "b_full": jax.random.normal(k[5], (1,),   jnp.float32) * 0.1,
    }
    encoder_out = jax.random.normal(k[6], (B, P, E), jnp.float32)
    decoder_hidden = jax.random.normal(k[7], (B, D), jnp.float32)

    prep = prepare_params(params)      # one-time transpose / bf16 cast / pad / fuse

    awe, alpha = attention_forward(encoder_out, decoder_hidden, prep)
    jax.block_until_ready((awe, alpha))

    # Tight check vs. mixed-precision reference (same bf16 MXU operands).
    awe_mx, alpha_mx = attention_reference(encoder_out, decoder_hidden, params,
                                           mxu_dtype=jnp.bfloat16)
    np.testing.assert_allclose(np.asarray(awe), np.asarray(awe_mx),
                               rtol=1e-3, atol=1e-3)
    np.testing.assert_allclose(np.asarray(alpha), np.asarray(alpha_mx),
                               rtol=1e-3, atol=1e-3)

    # Semantic check vs. the full-f32 PyTorch-equivalent reference
    # (bf16-level tolerance, since MXU operands are bf16 by design).
    awe_f32, alpha_f32 = attention_reference(encoder_out, decoder_hidden, params,
                                             mxu_dtype=jnp.float32)
    np.testing.assert_allclose(np.asarray(awe), np.asarray(awe_f32),
                               rtol=2e-2, atol=2e-2)
    np.testing.assert_allclose(np.asarray(alpha), np.asarray(alpha_f32),
                               rtol=2e-2, atol=2e-2)
    print("KERNEL_OK")
</pallas_src>

<mosaic_0001>
module attributes {stable_mosaic.version = 11 : i64} {
  func.func @attention_kernel(%arg0: i32, %arg1: memref<2x8x32xbf16, #tpu.memory_space<vmem>>, %arg2: memref<2x32xbf16, #tpu.memory_space<vmem>>, %arg3: memref<32x128xbf16, #tpu.memory_space<vmem>>, %arg4: memref<32x128xbf16, #tpu.memory_space<vmem>>, %arg5: memref<1x128xf32, #tpu.memory_space<vmem>>, %arg6: memref<1x128xf32, #tpu.memory_space<vmem>>, %arg7: memref<2x32xf32, #tpu.memory_space<vmem>>, %arg8: memref<2x128xf32, #tpu.memory_space<vmem>>) attributes {dimension_semantics = [#tpu.dimension_semantics<parallel>], iteration_bounds = array<i64: 1>, scalar_prefetch = 0 : i64, scratch_operands = 0 : i64, tpu.core_type = #tpu.core_type<tc>, window_params = [{transform_indices = @transform_0, window_bounds = array<i64: 2, 8, 32>}, {transform_indices = @transform_1, window_bounds = array<i64: 2, 32>}, {pipeline_mode = #tpu.pipeline_mode<synchronous>, transform_indices = @transform_2, window_bounds = array<i64: 32, 128>}, {pipeline_mode = #tpu.pipeline_mode<synchronous>, transform_indices = @transform_3, window_bounds = array<i64: 32, 128>}, {pipeline_mode = #tpu.pipeline_mode<synchronous>, transform_indices = @transform_4, window_bounds = array<i64: 1, 128>}, {pipeline_mode = #tpu.pipeline_mode<synchronous>, transform_indices = @transform_5, window_bounds = array<i64: 1, 128>}, {transform_indices = @transform_6, window_bounds = array<i64: 2, 32>}, {transform_indices = @transform_7, window_bounds = array<i64: 2, 128>}]} {
    %c0 = arith.constant 0 : index
    %c0_0 = arith.constant 0 : index
    %c0_1 = arith.constant 0 : index
    %0 = vector.load %arg1[%c0, %c0_0, %c0_1] : memref<2x8x32xbf16, #tpu.memory_space<vmem>>, vector<2x8x32xbf16>
    %1 = vector.shape_cast %0 : vector<2x8x32xbf16> to vector<16x32xbf16>
    %c0_2 = arith.constant 0 : index
    %c0_3 = arith.constant 0 : index
    %2 = vector.load %arg2[%c0_2, %c0_3] : memref<2x32xbf16, #tpu.memory_space<vmem>>, vector<2x32xbf16>
    %cst = arith.constant 0.000000e+00 : f32
    %3 = vector.broadcast %cst : f32 to vector<2x8xf32>
    %c0_4 = arith.constant 0 : index
    %c0_5 = arith.constant 0 : index
    %4 = vector.load %arg3[%c0_4, %c0_5] : memref<32x128xbf16, #tpu.memory_space<vmem>>, vector<32x128xbf16>
    %c0_6 = arith.constant 0 : index
    %c0_7 = arith.constant 0 : index
    %5 = vector.load %arg4[%c0_6, %c0_7] : memref<32x128xbf16, #tpu.memory_space<vmem>>, vector<32x128xbf16>
    %cst_8 = arith.constant dense<0.000000e+00> : vector<16x128xf32>
    %6 = tpu.matmul %1, %4, %cst_8 {dimension_numbers = #tpu.dot_dimension_numbers<[1], [0], [0], [1], [0, 0, 1, 1], [], []>} : vector<16x32xbf16>, vector<32x128xbf16>, vector<16x128xf32> -> vector<16x128xf32>
    %cst_9 = arith.constant dense<0.000000e+00> : vector<2x128xf32>
    %7 = tpu.matmul %2, %5, %cst_9 {dimension_numbers = #tpu.dot_dimension_numbers<[1], [0], [0], [1], [0, 0, 1, 1], [], []>} : vector<2x32xbf16>, vector<32x128xbf16>, vector<2x128xf32> -> vector<2x128xf32>
    %8 = vector.shape_cast %6 : vector<16x128xf32> to vector<2x8x128xf32>
    %9 = vector.shape_cast %7 : vector<2x128xf32> to vector<2x1x128xf32>
    %10 = vector.broadcast %9 : vector<2x1x128xf32> to vector<2x8x128xf32>
    %11 = arith.addf %8, %10 : vector<2x8x128xf32>
    %c0_10 = arith.constant 0 : index
    %c0_11 = arith.constant 0 : index
    %12 = vector.load %arg5[%c0_10, %c0_11] : memref<1x128xf32, #tpu.memory_space<vmem>>, vector<1x128xf32>
    %13 = vector.shape_cast %12 : vector<1x128xf32> to vector<1x1x128xf32>
    %14 = vector.broadcast %13 : vector<1x1x128xf32> to vector<2x8x128xf32>
    %15 = arith.addf %11, %14 : vector<2x8x128xf32>
    %cst_12 = arith.constant 0.000000e+00 : f32
    %16 = vector.broadcast %cst_12 : f32 to vector<2x8x128xf32>
    %17 = arith.maximumf %15, %16 : vector<2x8x128xf32>
    %c0_13 = arith.constant 0 : index
    %c0_14 = arith.constant 0 : index
    %18 = vector.load %arg6[%c0_13, %c0_14] : memref<1x128xf32, #tpu.memory_space<vmem>>, vector<1x128xf32>
    %19 = vector.shape_cast %18 : vector<1x128xf32> to vector<1x1x128xf32>
    %20 = vector.broadcast %19 : vector<1x1x128xf32> to vector<2x8x128xf32>
    %21 = arith.mulf %17, %20 : vector<2x8x128xf32>
    %cst_15 = arith.constant dense<0.000000e+00> : vector<2x8xf32>
    %22 = vector.multi_reduction <add>, %21, %cst_15 [2] : vector<2x8x128xf32> to vector<2x8xf32>
    %23 = arith.addf %3, %22 : vector<2x8xf32>
    %cst_16 = arith.constant dense<0xFF800000> : vector<2xf32>
    %24 = vector.multi_reduction <maximumf>, %23, %cst_16 [1] : vector<2x8xf32> to vector<2xf32>
    %25 = vector.shape_cast %24 : vector<2xf32> to vector<2x1xf32>
    %26 = vector.broadcast %25 : vector<2x1xf32> to vector<2x8xf32>
    %27 = arith.subf %23, %26 : vector<2x8xf32>
    %28 = math.exp %27 : vector<2x8xf32>
    %cst_17 = arith.constant dense<0.000000e+00> : vector<2xf32>
    %29 = vector.multi_reduction <add>, %28, %cst_17 [1] : vector<2x8xf32> to vector<2xf32>
    %30 = vector.shape_cast %29 : vector<2xf32> to vector<2x1xf32>
    %31 = tpu.reciprocal %30 {approx = true} : vector<2x1xf32> -> vector<2x1xf32>
    %32 = arith.mulf %30, %31 : vector<2x1xf32>
    %cst_18 = arith.constant 2.000000e+00 : f32
    %33 = vector.broadcast %cst_18 : f32 to vector<2x1xf32>
    %34 = arith.subf %33, %32 : vector<2x1xf32>
    %35 = arith.mulf %31, %34 : vector<2x1xf32>
    %36 = vector.broadcast %35 : vector<2x1xf32> to vector<2x8xf32>
    %37 = arith.mulf %28, %36 : vector<2x8xf32>
    %cst_19 = arith.constant 0.000000e+00 : f32
    %38 = vector.broadcast %cst_19 : f32 to vector<2x120xf32>
    %39 = tpu.concatenate %37, %38 in 1 : vector<2x8xf32>, vector<2x120xf32> -> vector<2x128xf32>
    %c0_20 = arith.constant 0 : index
    %c0_21 = arith.constant 0 : index
    %40 = vector.load %arg8[%c0_20, %c0_21] : memref<2x128xf32, #tpu.memory_space<vmem>>, vector<2x128xf32>
    tpu.vector_store %arg8[%c0_20, %c0_21], %39 {strides = array<i32>} : memref<2x128xf32, #tpu.memory_space<vmem>>, vector<2x128xf32>,
    %41 = vector.shape_cast %37 : vector<2x8xf32> to vector<2x8x1xf32>
    %42 = arith.extf %0 : vector<2x8x32xbf16> to vector<2x8x32xf32>
    %43 = vector.broadcast %41 : vector<2x8x1xf32> to vector<2x8x32xf32>
    %44 = arith.mulf %42, %43 : vector<2x8x32xf32>
    %cst_22 = arith.constant dense<0.000000e+00> : vector<2x32xf32>
    %45 = vector.multi_reduction <add>, %44, %cst_22 [1] : vector<2x8x32xf32> to vector<2x32xf32>
    %c0_23 = arith.constant 0 : index
    %c0_24 = arith.constant 0 : index
    %46 = vector.load %arg7[%c0_23, %c0_24] : memref<2x32xf32, #tpu.memory_space<vmem>>, vector<2x32xf32>
    tpu.vector_store %arg7[%c0_23, %c0_24], %45 {strides = array<i32>} : memref<2x32xf32, #tpu.memory_space<vmem>>, vector<2x32xf32>,
    return
  }
  func.func @transform_0(%arg0: i32) -> (i32, i32, i32) {
    %c0_i32 = arith.constant 0 : i32
    %c0_i32_0 = arith.constant 0 : i32
    %c0_i32_1 = arith.constant 0 : i32
    return %arg0, %c0_i32, %c0_i32_0 : i32, i32, i32
  }
  func.func @transform_1(%arg0: i32) -> (i32, i32) {
    %c0_i32 = arith.constant 0 : i32
    %c0_i32_0 = arith.constant 0 : i32
    return %arg0, %c0_i32 : i32, i32
  }
  func.func @transform_2(%arg0: i32) -> (i32, i32) {
    %c0_i32 = arith.constant 0 : i32
    %c0_i32_0 = arith.constant 0 : i32
    %c0_i32_1 = arith.constant 0 : i32
    return %c0_i32, %c0_i32_0 : i32, i32
  }
  func.func @transform_3(%arg0: i32) -> (i32, i32) {
    %c0_i32 = arith.constant 0 : i32
    %c0_i32_0 = arith.constant 0 : i32
    %c0_i32_1 = arith.constant 0 : i32
    return %c0_i32, %c0_i32_0 : i32, i32
  }
  func.func @transform_4(%arg0: i32) -> (i32, i32) {
    %c0_i32 = arith.constant 0 : i32
    %c0_i32_0 = arith.constant 0 : i32
    %c0_i32_1 = arith.constant 0 : i32
    return %c0_i32, %c0_i32_0 : i32, i32
  }
  func.func @transform_5(%arg0: i32) -> (i32, i32) {
    %c0_i32 = arith.constant 0 : i32
    %c0_i32_0 = arith.constant 0 : i32
    %c0_i32_1 = arith.constant 0 : i32
    return %c0_i32, %c0_i32_0 : i32, i32
  }
  func.func @transform_6(%arg0: i32) -> (i32, i32) {
    %c0_i32 = arith.constant 0 : i32
    %c0_i32_0 = arith.constant 0 : i32
    return %arg0, %c0_i32 : i32, i32
  }
  func.func @transform_7(%arg0: i32) -> (i32, i32) {
    %c0_i32 = arith.constant 0 : i32
    %c0_i32_0 = arith.constant 0 : i32
    return %arg0, %c0_i32 : i32, i32
  }
}

module attributes {stable_mosaic.version = 11 : i64} {
  func.func @attention_kernel(%arg0: i32, %arg1: memref<2x8x32xbf16, #tpu.memory_space<vmem>>, %arg2: memref<2x32xbf16, #tpu.memory_space<vmem>>, %arg3: memref<32x128xbf16, #tpu.memory_space<vmem>>, %arg4: memref<32x128xbf16, #tpu.memory_space<vmem>>, %arg5: memref<1x128xf32, #tpu.memory_space<vmem>>, %arg6: memref<1x128xf32, #tpu.memory_space<vmem>>, %arg7: memref<2x32xf32, #tpu.memory_space<vmem>>, %arg8: memref<2x8xf32, #tpu.memory_space<vmem>>) attributes {dimension_semantics = [#tpu.dimension_semantics<parallel>], iteration_bounds = array<i64: 1>, scalar_prefetch = 0 : i64, scratch_operands = 0 : i64, tpu.core_type = #tpu.core_type<tc>, window_params = [{transform_indices = @transform_0, window_bounds = array<i64: 2, 8, 32>}, {transform_indices = @transform_1, window_bounds = array<i64: 2, 32>}, {pipeline_mode = #tpu.pipeline_mode<synchronous>, transform_indices = @transform_2, window_bounds = array<i64: 32, 128>}, {pipeline_mode = #tpu.pipeline_mode<synchronous>, transform_indices = @transform_3, window_bounds = array<i64: 32, 128>}, {pipeline_mode = #tpu.pipeline_mode<synchronous>, transform_indices = @transform_4, window_bounds = array<i64: 1, 128>}, {pipeline_mode = #tpu.pipeline_mode<synchronous>, transform_indices = @transform_5, window_bounds = array<i64: 1, 128>}, {transform_indices = @transform_6, window_bounds = array<i64: 2, 32>}, {transform_indices = @transform_7, window_bounds = array<i64: 2, 8>}]} {
    %c0 = arith.constant 0 : index
    %c0_0 = arith.constant 0 : index
    %c0_1 = arith.constant 0 : index
    %0 = vector.load %arg1[%c0, %c0_0, %c0_1] : memref<2x8x32xbf16, #tpu.memory_space<vmem>>, vector<2x8x32xbf16>
    %1 = vector.shape_cast %0 : vector<2x8x32xbf16> to vector<16x32xbf16>
    %c0_2 = arith.constant 0 : index
    %c0_3 = arith.constant 0 : index
    %2 = vector.load %arg2[%c0_2, %c0_3] : memref<2x32xbf16, #tpu.memory_space<vmem>>, vector<2x32xbf16>
    %cst = arith.constant 0.000000e+00 : f32
    %3 = vector.broadcast %cst : f32 to vector<2x8xf32>
    %c0_4 = arith.constant 0 : index
    %c0_5 = arith.constant 0 : index
    %4 = vector.load %arg3[%c0_4, %c0_5] : memref<32x128xbf16, #tpu.memory_space<vmem>>, vector<32x128xbf16>
    %c0_6 = arith.constant 0 : index
    %c0_7 = arith.constant 0 : index
    %5 = vector.load %arg4[%c0_6, %c0_7] : memref<32x128xbf16, #tpu.memory_space<vmem>>, vector<32x128xbf16>
    %cst_8 = arith.constant dense<0.000000e+00> : vector<16x128xf32>
    %6 = tpu.matmul %1, %4, %cst_8 {dimension_numbers = #tpu.dot_dimension_numbers<[1], [0], [0], [1], [0, 0, 1, 1], [], []>} : vector<16x32xbf16>, vector<32x128xbf16>, vector<16x128xf32> -> vector<16x128xf32>
    %cst_9 = arith.constant dense<0.000000e+00> : vector<2x128xf32>
    %7 = tpu.matmul %2, %5, %cst_9 {dimension_numbers = #tpu.dot_dimension_numbers<[1], [0], [0], [1], [0, 0, 1, 1], [], []>} : vector<2x32xbf16>, vector<32x128xbf16>, vector<2x128xf32> -> vector<2x128xf32>
    %8 = vector.shape_cast %6 : vector<16x128xf32> to vector<2x8x128xf32>
    %9 = vector.shape_cast %7 : vector<2x128xf32> to vector<2x1x128xf32>
    %10 = vector.broadcast %9 : vector<2x1x128xf32> to vector<2x8x128xf32>
    %11 = arith.addf %8, %10 : vector<2x8x128xf32>
    %c0_10 = arith.constant 0 : index
    %c0_11 = arith.constant 0 : index
    %12 = vector.load %arg5[%c0_10, %c0_11] : memref<1x128xf32, #tpu.memory_space<vmem>>, vector<1x128xf32>
    %13 = vector.shape_cast %12 : vector<1x128xf32> to vector<1x1x128xf32>
    %14 = vector.broadcast %13 : vector<1x1x128xf32> to vector<2x8x128xf32>
    %15 = arith.addf %11, %14 : vector<2x8x128xf32>
    %cst_12 = arith.constant 0.000000e+00 : f32
    %16 = vector.broadcast %cst_12 : f32 to vector<2x8x128xf32>
    %17 = arith.maximumf %15, %16 : vector<2x8x128xf32>
    %c0_13 = arith.constant 0 : index
    %c0_14 = arith.constant 0 : index
    %18 = vector.load %arg6[%c0_13, %c0_14] : memref<1x128xf32, #tpu.memory_space<vmem>>, vector<1x128xf32>
    %19 = vector.shape_cast %18 : vector<1x128xf32> to vector<1x1x128xf32>
    %20 = vector.broadcast %19 : vector<1x1x128xf32> to vector<2x8x128xf32>
    %21 = arith.mulf %17, %20 : vector<2x8x128xf32>
    %cst_15 = arith.constant dense<0.000000e+00> : vector<2x8xf32>
    %22 = vector.multi_reduction <add>, %21, %cst_15 [2] : vector<2x8x128xf32> to vector<2x8xf32>
    %23 = arith.addf %3, %22 : vector<2x8xf32>
    %cst_16 = arith.constant dense<0xFF800000> : vector<2xf32>
    %24 = vector.multi_reduction <maximumf>, %23, %cst_16 [1] : vector<2x8xf32> to vector<2xf32>
    %25 = vector.shape_cast %24 : vector<2xf32> to vector<2x1xf32>
    %26 = vector.broadcast %25 : vector<2x1xf32> to vector<2x8xf32>
    %27 = arith.subf %23, %26 : vector<2x8xf32>
    %28 = math.exp %27 : vector<2x8xf32>
    %cst_17 = arith.constant dense<0.000000e+00> : vector<2xf32>
    %29 = vector.multi_reduction <add>, %28, %cst_17 [1] : vector<2x8xf32> to vector<2xf32>
    %30 = vector.shape_cast %29 : vector<2xf32> to vector<2x1xf32>
    %31 = tpu.reciprocal %30 {approx = true} : vector<2x1xf32> -> vector<2x1xf32>
    %32 = arith.mulf %30, %31 : vector<2x1xf32>
    %cst_18 = arith.constant 2.000000e+00 : f32
    %33 = vector.broadcast %cst_18 : f32 to vector<2x1xf32>
    %34 = arith.subf %33, %32 : vector<2x1xf32>
    %35 = arith.mulf %31, %34 : vector<2x1xf32>
    %36 = vector.broadcast %35 : vector<2x1xf32> to vector<2x8xf32>
    %37 = arith.mulf %28, %36 : vector<2x8xf32>
    %c0_19 = arith.constant 0 : index
    %c0_20 = arith.constant 0 : index
    %38 = vector.load %arg8[%c0_19, %c0_20] : memref<2x8xf32, #tpu.memory_space<vmem>>, vector<2x8xf32>
    tpu.vector_store %arg8[%c0_19, %c0_20], %37 {strides = array<i32>} : memref<2x8xf32, #tpu.memory_space<vmem>>, vector<2x8xf32>,
    %39 = vector.shape_cast %37 : vector<2x8xf32> to vector<2x8x1xf32>
    %40 = arith.extf %0 : vector<2x8x32xbf16> to vector<2x8x32xf32>
    %41 = vector.broadcast %39 : vector<2x8x1xf32> to vector<2x8x32xf32>
    %42 = arith.mulf %40, %41 : vector<2x8x32xf32>
    %cst_21 = arith.constant dense<0.000000e+00> : vector<2x32xf32>
    %43 = vector.multi_reduction <add>, %42, %cst_21 [1] : vector<2x8x32xf32> to vector<2x32xf32>
    %c0_22 = arith.constant 0 : index
    %c0_23 = arith.constant 0 : index
    %44 = vector.load %arg7[%c0_22, %c0_23] : memref<2x32xf32, #tpu.memory_space<vmem>>, vector<2x32xf32>
    tpu.vector_store %arg7[%c0_22, %c0_23], %43 {strides = array<i32>} : memref<2x32xf32, #tpu.memory_space<vmem>>, vector<2x32xf32>,
    return
  }
  func.func @transform_0(%arg0: i32) -> (i32, i32, i32) {
    %c0_i32 = arith.constant 0 : i32
    %c0_i32_0 = arith.constant 0 : i32
    %c0_i32_1 = arith.constant 0 : i32
    return %arg0, %c0_i32, %c0_i32_0 : i32, i32, i32
  }
  func.func @transform_1(%arg0: i32) -> (i32, i32) {
    %c0_i32 = arith.constant 0 : i32
    %c0_i32_0 = arith.constant 0 : i32
    return %arg0, %c0_i32 : i32, i32
  }
  func.func @transform_2(%arg0: i32) -> (i32, i32) {
    %c0_i32 = arith.constant 0 : i32
    %c0_i32_0 = arith.constant 0 : i32
    %c0_i32_1 = arith.constant 0 : i32
    return %c0_i32, %c0_i32_0 : i32, i32
  }
  func.func @transform_3(%arg0: i32) -> (i32, i32) {
    %c0_i32 = arith.constant 0 : i32
    %c0_i32_0 = arith.constant 0 : i32
    %c0_i32_1 = arith.constant 0 : i32
    return %c0_i32, %c0_i32_0 : i32, i32
  }
  func.func @transform_4(%arg0: i32) -> (i32, i32) {
    %c0_i32 = arith.constant 0 : i32
    %c0_i32_0 = arith.constant 0 : i32
    %c0_i32_1 = arith.constant 0 : i32
    return %c0_i32, %c0_i32_0 : i32, i32
  }
  func.func @transform_5(%arg0: i32) -> (i32, i32) {
    %c0_i32 = arith.constant 0 : i32
    %c0_i32_0 = arith.constant 0 : i32
    %c0_i32_1 = arith.constant 0 : i32
    return %c0_i32, %c0_i32_0 : i32, i32
  }
  func.func @transform_6(%arg0: i32) -> (i32, i32) {
    %c0_i32 = arith.constant 0 : i32
    %c0_i32_0 = arith.constant 0 : i32
    return %arg0, %c0_i32 : i32, i32
  }
  func.func @transform_7(%arg0: i32) -> (i32, i32) {
    %c0_i32 = arith.constant 0 : i32
    %c0_i32_0 = arith.constant 0 : i32
    return %arg0, %c0_i32 : i32, i32
  }
}

</mosaic_0001>

<bundles_post_ra>
// kernel: tpu_custom_call.1
= control target key start
LH: loop header
LB: loop body
LE: loop exit
PB: predicated region body
PF: predicated region fallthrough
CT: control target
= control target key end

     0   :  { %13 = vsyncpa [#allocation3], 0  ;;  %s746_s0 = inlined_call_operand.hbm [shape: bf16[2,8,32], index: 0, kind: input, shape index: {}]   ;;  %s747_s1 = inlined_call_operand.vmem [shape: bf16[2,32], index: 1, kind: input, shape index: {}]   ;;  %s748_s2 = inlined_call_operand.hbm [shape: bf16[32,128], index: 2, kind: input, shape index: {}]   ;;  %s749_s3 = inlined_call_operand.hbm [shape: bf16[32,128], index: 3, kind: input, shape index: {}]   ;;  %s750_s4 = inlined_call_operand.vmem [shape: f32[1,128], index: 4, kind: input, shape index: {}]   ;;  %s751_s5 = inlined_call_operand.vmem [shape: f32[1,128], index: 5, kind: input, shape index: {}]   ;;  %s752_s6 = inlined_call_operand.hbm [shape: f32[2,32], index: 6, kind: output, shape index: {0}]   ;;  %s753_s7 = inlined_call_operand.hbm [shape: f32[2,128], index: 7, kind: output, shape index: {1}]  }
   0x1   :  { %14 = vsyncpa [#allocation6], 0 }
   0x2   :  { %15 = vsyncpa [#allocation4], 0 }
   0x3   :  { %16 = vsyncpa [#allocation10], 0  ;;  %s583_s24 = smov [#allocation5]   ;;  %s584_s26 = smov [#allocation2]  }
   0x4   :  { %s36_s25 = sshll.u32 %s583_s24, 4  ;;  %s22_s27 = sshll.u32 %s584_s26, 4  ;;  %s37_s25 = int_to_ptr.vmem [resolvable:$true] %s36_s25  ;;  %s634_s27 = int_to_ptr.vmem [resolvable:$true] %s22_s27 }
   0x5   :  { %s465_s30 = scalar_lea.hbm %s748_s2, 256 }
   0x6   :  { %p466_p0 = scmp.ne.s32.totalorder %s748_s2, %s465_s30  ;;  %p469_p1 = scmp.lt.u32.totalorder %s465_s30, %s748_s2 }
   0x8   :  { %p471_p2 = pnand %p469_p1, %p466_p0 }
   0xa   :  { %474 = shalt.err (!%p471_p2)
}
   0xb   :  { %s475_s12 = scalar_lea.vmem %s37_s25, 256  ;;  %p480_p4 = scmp.lt.s32.totalorder %s37_s25, %s37_s25 }
   0xc   :  { %p476_p3 = scmp.ne.s32.totalorder %s37_s25, %s475_s12  ;;  %p481_p5 = scmp.lt.s32.totalorder %s475_s12, %s475_s12 }
   0xe   :  { %p482_p6 = por %p481_p5, %p480_p4 }
  0x10   :  { %p483_p7 = pnand %p482_p6, %p476_p3 }
  0x12   :  { %486 = shalt.err (!%p483_p7)
}
  0x13   :  { %s585_s13 = smov 64   ;;  %s586_s14 = smov 4  }
  0x14   :  { %42 = dma.hbm_to_vmem [thread:$0]  %s748_s2, 256, %s37_s25, [#allocation6], %s585_s13, %s585_s13, %s586_s14  }
  0x15   :  { %s487_s19 = scalar_lea.hbm %s746_s0, 128 }
  0x16   :  { %p488_p8 = scmp.ne.s32.totalorder %s746_s0, %s487_s19  ;;  %p491_p9 = scmp.lt.u32.totalorder %s487_s19, %s746_s0 }
  0x18   :  { %p493_p10 = pnand %p491_p9, %p488_p8 }
  0x1a   :  { %496 = shalt.err (!%p493_p10)
}
  0x1b   :  { %s497_s24 = scalar_lea.vmem %s634_s27, 128  ;;  %p502_p12 = scmp.lt.s32.totalorder %s634_s27, %s634_s27 }
  0x1c   :  { %p498_p11 = scmp.ne.s32.totalorder %s634_s27, %s497_s24  ;;  %p503_p13 = scmp.lt.s32.totalorder %s497_s24, %s497_s24 }
  0x1e   :  { %p504_p0 = por %p503_p13, %p502_p12 }
  0x20   :  { %p505_p1 = pnand %p504_p0, %p498_p11 }
  0x22   :  { %508 = shalt.err (!%p505_p1)
}
  0x23   :  { %28 = dma.hbm_to_vmem [thread:$0]  %s746_s0, 128, %s634_s27, [#allocation3], %s585_s13, %s585_s13, %s586_s14  }
  0x24   :  { %s587_s26 = smov [#allocation7]   ;;  %s509_s8 = scalar_lea.hbm %s749_s3, 256 }
  0x25   :  { %s48_s28 = sshll.u32 %s587_s26, 4  ;;  %p510_p2 = scmp.ne.s32.totalorder %s749_s3, %s509_s8  ;;  %s49_s28 = int_to_ptr.vmem [resolvable:$true] %s48_s28 }
  0x26   :  { %p513_p3 = scmp.lt.u32.totalorder %s509_s8, %s749_s3 }
  0x28   :  { %p515_p4 = pnand %p513_p3, %p510_p2 }
  0x2a   :  { %518 = shalt.err (!%p515_p4)
}
  0x2b   :  { %s519_s15 = scalar_lea.vmem %s49_s28, 256  ;;  %p524_p6 = scmp.lt.s32.totalorder %s49_s28, %s49_s28 }
  0x2c   :  { %p520_p5 = scmp.ne.s32.totalorder %s49_s28, %s519_s15  ;;  %p525_p7 = scmp.lt.s32.totalorder %s519_s15, %s519_s15 }
  0x2e   :  { %p526_p8 = por %p525_p7, %p524_p6 }
  0x30   :  { %p527_p9 = pnand %p526_p8, %p520_p5 }
  0x32   :  { %530 = shalt.err (!%p527_p9)
}
  0x33   :  { %54 = dma.hbm_to_vmem [thread:$0]  %s749_s3, 256, %s49_s28, [#allocation6], %s585_s13, %s585_s13, %s586_s14  }
  0x34   :  { %575 = dma.done.wait [#allocation3], 128  }
  0x35   :  { %576 = vsyncadd [#allocation3], 4294967168 }
  0x36   :  { %577 = dma.done.wait [#allocation6], 512  }
  0x37   :  { %578 = vsyncadd [#allocation6], 4294966784  ;;  %v588_v0 = vmov 0.0   ;;  %vm589_vm0 = vmmov 0   ;;  %v453_v1 = vld [vmem:[#allocation7] sm:$0xff]   ;;  %v454_v2 = vld [vmem:[#allocation5] sm:$0xff]   ;;  %v201_v9 = vlaneseq }
  0x38   :  { %432 = vmatprep.subr.bf16.mxu1 %v588_v0  ;;  %424 = vmatprep.subr.bf16.mxu0 %v588_v0  ;;  %v455_v3 = vld [vmem:[#allocation7 + $0x8] sm:$0xff]   ;;  %v456_v4 = vld [vmem:[#allocation5 + $0x8] sm:$0xff]   ;;  %vm97_vm1 = vcmask 261120   ;;  %v590_v7 = vmov 1966171168   ;;  %vm270_vm2 = vcmask 1041409  }
  0x39   :  { %436 = vmatprep.mubr.msk.bf16.mxu1 %vm589_vm0, %v588_v0  ;;  %428 = vmatprep.mubr.msk.bf16.mxu0 %vm589_vm0, %v588_v0  ;;  %v686_v5 = vld [vmem:[#allocation2] sm:$0xff]   ;;  %v199_v8 = vunpack.c.l.s4 %v590_v7  ;;  %v694_v11 = vshrl.u32 %v201_v9, 7  ;;  %v261_v38 = vand.u32 127, %v201_v9  ;;  %vm273_vm3 = vcmask 58368  }
  0x3a   :  { %433 = vmatpush3.bf16.msra.mxu1 %v453_v1  ;;  %425 = vmatpush3.bf16.msra.mxu0 %v454_v2  ;;  %v71_v6 = vld [vmem:[%s747_s1] sm:$0x1]  ;;  %v591_v46 = vmov 0   ;;  %v353_v9 = vunpack.c.l.bf16 %v686_v5  ;;  %vm350_vm4 = vcmask 64512  }
  0x3b   :  { %434 = vmatprep.subr.bf16.mxu1 %v588_v0  ;;  %426 = vmatprep.subr.bf16.mxu0 %v588_v0  ;;  %v200_v10 = vunpack.c.0.s8 %v199_v8  ;;  %v698_v17 = vsub.s32 0, %v694_v11  ;;  %v416_v27 = vld [vmem:[%s750_s4] ss:$0 sm:$0xff]  ;;  %v264_v40 = vsub.s32 %v261_v38, %v694_v11  ;;  %v284_v47 = vsub.s32 1, %v694_v11  ;;  %s592_s4 = smov [#allocation9]  }
  0x3c   :  { %v417_v32 = vld [vmem:[%s751_s5] ss:$0 sm:$0xff]  ;;  %452 = vset.pattern.permute.xlu0 %v591_v46  ;;  %451 = vset.pattern.permute.xlu1 %v591_v46  ;;  %s395_s5 = sshll.u32 %s592_s4, 4  ;;  %s396_s5 = int_to_ptr.vmem [resolvable:$true] %s395_s5 }
  0x3d   :  { %v203_v12 = vsub.s32 %v200_v10, %v694_v11  ;;  %s531_s18 = scalar_lea.vmem %s396_s5, 32  ;;  %p536_p11 = scmp.lt.s32.totalorder %s396_s5, %s396_s5 }
  0x3e   :  { %435 = vmatpush3.bf16.msra.mxu1 %v455_v3  ;;  %427 = vmatpush3.bf16.msra.mxu0 %v456_v4  ;;  %p532_p10 = scmp.ne.s32.totalorder %s396_s5, %s531_s18  ;;  %p537_p12 = scmp.lt.s32.totalorder %s531_s18, %s531_s18 }
  0x40   :  { %p538_p13 = por %p537_p12, %p536_p11 }
  0x41   :  { %437 = vmatmul.mubr.msk.bf16.vlgmr.msra.gmra.mrb[0].mxu1 %vm97_vm1, %v71_v6  ;;  %429 = vmatmul.mubr.msk.bf16.vlgmr.msra.gmra.mrb[0].mxu0 %vm97_vm1, %v686_v5 }
  0x42   :  { %p539_p0 = pnand %p538_p13, %p532_p10 }
 0x114   :  { %v191_v13 = vpop.f32.mrb[0].mxu1  ;;  %v135_v16 = vpop.f32.mrb[0].mxu0 }
 0x115   :  { %v204_v14 = vrot.slane %v191_v13, %v203_v12  ;;  %v438_v15 = vpop.f32.mrb[1].mxu1  ;;  %v430_v19 = vpop.f32.mrb[1].mxu0 }
 0x116   :  { %v194_v18 = vpop.f32.mrb[2].mxu1  ;;  %v138_v23 = vpop.f32.mrb[2].mxu0 }
 0x117   :  { %v205_v20 = vcombine.high %v204_v14, %v204_v14  ;;  %v212_v21 = vrot.slane %v204_v14, %v203_v12  ;;  %v439_v22 = vpop.f32.mrb[3].mxu1  ;;  %v431_v24 = vpop.f32.mrb[3].mxu0 }
 0x119   :  { %v223_v25 = vrot.slane %v212_v21, %v698_v17  ;;  %v219_v26 = vrot.slane %v205_v20, %v203_v12  ;;  %v354_v12 = vunpack.c.h.bf16 %v686_v5 }
 0x11b   :  { %v230_v28 = vadd.f32 %v223_v25, %v135_v16  ;;  %v227_v29 = vrot.slane %v219_v26, %v698_v17 }
 0x11d   :  { %v231_v30 = vadd.f32 %v227_v29, %v138_v23  ;;  %v239_v31 = vadd.f32 %v416_v27, %v230_v28 }
 0x11f   :  { %v240_v33 = vadd.f32 %v416_v27, %v231_v30  ;;  %v241_v34 = vmax.f32 %v239_v31, 0.0 }
 0x121   :  { %v242_v35 = vmax.f32 %v240_v33, 0.0  ;;  %v250_v36 = vmul.f32 %v417_v32, %v241_v34 }
 0x123   :  { %252 = vadd.xlane.f32.xlu0 %v250_v36  ;;  %v251_v37 = vmul.f32 %v417_v32, %v242_v35 }
 0x127   :  { %254 = vadd.xlane.f32.xlu0 %v251_v37 }
 0x1b0   :  { %v253_v39 = vpop.xlane.xlu0 %252 }
 0x1b1   :  { %v265_v42 = vrot.slane %v253_v39, %v264_v40 }
 0x1b4   :  { %v255_v41 = vpop.xlane.xlu0 %254 }
 0x1b5   :  { %v269_v43 = vrot.slane %v255_v41, %v264_v40 }
 0x1b7   :  { %v271_v44 = vsel %vm270_vm2, %v269_v43, %v265_v42 }
 0x1b8   :  { %v274_v45 = vsel %vm273_vm3, %v271_v44, -inf }
 0x1b9   :  { %275 = vmax.xlane.f32.xlu1 %v274_v45 }
 0x246   :  { %v276_v48 = vpop.xlane.xlu1 %275 }
 0x247   :  { %v281_v49 = vrot.slane %v276_v48, %v698_v17  ;;  %v285_v50 = vrot.slane %v276_v48, %v284_v47 }
 0x249   :  { %v288_v51 = vsub.f32 %v253_v39, %v281_v49  ;;  %v289_v52 = vsub.f32 %v255_v41, %v285_v50 }
 0x24b   :  { %v290_v53 = vmul.f32 1.442695, %v288_v51  ;;  %v292_v54 = vmul.f32 1.442695, %v289_v52 }
 0x24d   :  { %459 = vpow2.f32 %v290_v53 }
 0x24e   :  { %461 = vpow2.f32 %v292_v54 }
 0x257   :  { %v460_v55 = vpop.eup %459 }
 0x258   :  { %v462_v56 = vpop.eup %461  ;;  %297 = vperm.xlu1 %451, %v460_v55  }
 0x259   :  { %300 = vperm.xlu0 %452, %v462_v56  }
 0x2d7   :  { %v298_v57 = vpop.permute.xlu1 %297 }
 0x2d8   :  { %v301_v58 = vpop.permute.xlu0 %300  ;;  %v305_v59 = vrot.slane %v298_v57, %v264_v40 }
 0x2d9   :  { %v309_v60 = vrot.slane %v301_v58, %v264_v40 }
 0x2db   :  { %v310_v61 = vsel %vm270_vm2, %v309_v60, %v305_v59 }
 0x2dc   :  { %v312_v62 = vsel %vm273_vm3, %v310_v61, 0.0 }
 0x2dd   :  { %313 = vadd.xlane.f32.xlu1 %v312_v62 }
 0x36a   :  { %v314_v63 = vpop.xlane.xlu1 %313 }
 0x36b   :  { %463 = vrcp.f32 %v314_v63 }
 0x375   :  { %v464_v0 = vpop.eup %463 }
 0x376   :  { %v316_v1 = vmul.f32 %v464_v0, %v314_v63 }
 0x378   :  { %v317_v2 = vsub.f32 2.0, %v316_v1 }
 0x37a   :  { %v318_v3 = vmul.f32 %v464_v0, %v317_v2 }
 0x37c   :  { %v323_v4 = vrot.slane %v318_v3, %v698_v17  ;;  %v327_v6 = vrot.slane %v318_v3, %v284_v47 }
 0x37e   :  { %v330_v7 = vmul.f32 %v460_v55, %v323_v4  ;;  %v331_v8 = vmul.f32 %v462_v56, %v327_v6 }
 0x380   :  { %335 = vperm.xlu0 %452, %v330_v7  }
 0x384   :  { %338 = vperm.xlu0 %452, %v331_v8  }
 0x3ff   :  { %v336_v10 = vpop.permute.xlu0 %335 }
 0x400   :  { %v357_v11 = vmul.f32 %v353_v9, %v336_v10  ;;  %v343_v16 = vrot.slane %v336_v10, %v264_v40 }
 0x402   :  { %v359_v13 = vsel %vm97_vm1, %v357_v11, 0.0 }
 0x403   :  { %v360_v14 = vrot.slane %v359_v13, 4  ;;  %v339_v15 = vpop.permute.xlu0 %338 }
 0x404   :  { %v347_v18 = vrot.slane %v339_v15, %v264_v40  ;;  %v358_v17 = vmul.f32 %v354_v12, %v339_v15 }
 0x405   :  { %v361_v19 = vadd.f32 %v360_v14, %v359_v13 }
 0x406   :  { %v366_v20 = vsel %vm97_vm1, %v358_v17, 0.0  ;;  %v348_v21 = vsel %vm270_vm2, %v347_v18, %v343_v16 }
 0x407   :  { %v362_v22 = vrot.slane %v361_v19, 2  ;;  %v367_v23 = vrot.slane %v366_v20, 4  ;;  %v351_v24 = vsel %vm350_vm4, %v348_v21, 0.0 }
 0x408   :  { %352 = vst [vmem:[#allocation9] sm:$0x3] %v351_v24 }
 0x409   :  { %v363_v5 = vadd.f32 %v362_v22, %v361_v19  ;;  %v368_v25 = vadd.f32 %v367_v23, %v366_v20 }
 0x40a   :  { %542 = shalt.err (!%p539_p0)
}
 0x40b   :  { %s543_s21 = scalar_lea.hbm %s753_s7, 32 }
 0x40c   :  { %p544_p1 = scmp.ne.s32.totalorder %s753_s7, %s543_s21  ;;  %p547_p2 = scmp.lt.u32.totalorder %s543_s21, %s753_s7 }
 0x40e   :  { %p549_p3 = pnand %p547_p2, %p544_p1 }
 0x410   :  { %552 = shalt.err (!%p549_p3)
}
 0x411   :  { %398 = dma.vmem_to_hbm [thread:$0]  %s396_s5, 32, %s753_s7, [#allocation10]   ;;  %v369_v26 = vrot.slane %v368_v25, 2  ;;  %v364_v27 = vrot.slane %v363_v5, 1  ;;  %vm377_vm5 = vcmask 254976  }
 0x412   :  { %s593_s28 = smov [#allocation8]  }
 0x413   :  { %v370_v28 = vadd.f32 %v369_v26, %v368_v25  ;;  %s385_s29 = sshll.u32 %s593_s28, 4  ;;  %v365_v31 = vadd.f32 %v364_v27, %v363_v5  ;;  %s386_s29 = int_to_ptr.vmem [resolvable:$true] %s385_s29 }
 0x414   :  { %s553_s30 = scalar_lea.vmem %s386_s29, 32  ;;  %p558_p5 = scmp.lt.s32.totalorder %s386_s29, %s386_s29 }
 0x415   :  { %v371_v29 = vrot.slane %v370_v28, 1  ;;  %p554_p4 = scmp.ne.s32.totalorder %s386_s29, %s553_s30  ;;  %p559_p6 = scmp.lt.s32.totalorder %s553_s30, %s553_s30 }
 0x417   :  { %v372_v30 = vadd.f32 %v371_v29, %v370_v28  ;;  %p560_p7 = por %p559_p6, %p558_p5 }
 0x419   :  { %v375_v32 = vsel %vm270_vm2, %v372_v30, %v365_v31  ;;  %p561_p8 = pnand %p560_p7, %p554_p4 }
 0x41a   :  { %378 = vst.msk [vmem:[#allocation8] sm:$0x3] %vm377_vm5, %v375_v32 }
 0x41b   :  { %564 = shalt.err (!%p561_p8)
}
 0x41c   :  { %s565_s9 = scalar_lea.hbm %s752_s6, 32 }
 0x41d   :  { %p566_p9 = scmp.ne.s32.totalorder %s752_s6, %s565_s9  ;;  %p569_p10 = scmp.lt.u32.totalorder %s565_s9, %s752_s6 }
 0x41f   :  { %p571_p11 = pnand %p569_p10, %p566_p9 }
 0x421   :  { %574 = shalt.err (!%p571_p11)
}
 0x422   :  { %388 = dma.vmem_to_hbm [thread:$0]  %s386_s29, 32, %s752_s6, [#allocation4]  }
 0x423   :  { %579 = dma.done.wait [#allocation4], 32  }
 0x424   :  { %580 = vsyncadd [#allocation4], 4294967264 }
 0x425   :  { %581 = dma.done.wait [#allocation10], 32  }
 0x426   :  { %582 = vsyncadd [#allocation10], 4294967264 }
 0x427   :  { %405 = vsyncpa [#allocation3], 1 }
 0x428   :  { %406 = vsyncpa [#allocation6], 1 }
 0x429   :  { %407 = vsyncpa [#allocation4], 1 }
 0x42a   :  { %408 = vsyncpa [#allocation10], 1 }

// kernel: tpu_custom_call.1
= control target key start
LH: loop header
LB: loop body
LE: loop exit
PB: predicated region body
PF: predicated region fallthrough
CT: control target
= control target key end

     0   :  { %13 = vsyncpa [#allocation3], 0  ;;  %s745_s0 = inlined_call_operand.hbm [shape: bf16[2,8,32], index: 0, kind: input, shape index: {}]   ;;  %s746_s1 = inlined_call_operand.vmem [shape: bf16[2,32], index: 1, kind: input, shape index: {}]   ;;  %s747_s2 = inlined_call_operand.hbm [shape: bf16[32,128], index: 2, kind: input, shape index: {}]   ;;  %s748_s3 = inlined_call_operand.hbm [shape: bf16[32,128], index: 3, kind: input, shape index: {}]   ;;  %s749_s4 = inlined_call_operand.vmem [shape: f32[1,128], index: 4, kind: input, shape index: {}]   ;;  %s750_s5 = inlined_call_operand.vmem [shape: f32[1,128], index: 5, kind: input, shape index: {}]   ;;  %s751_s6 = inlined_call_operand.hbm [shape: f32[2,32], index: 6, kind: output, shape index: {0}]   ;;  %s752_s7 = inlined_call_operand.hbm [shape: f32[2,8], index: 7, kind: output, shape index: {1}]  }
   0x1   :  { %14 = vsyncpa [#allocation6], 0 }
   0x2   :  { %15 = vsyncpa [#allocation4], 0 }
   0x3   :  { %16 = vsyncpa [#allocation10], 0  ;;  %s581_s24 = smov [#allocation5]   ;;  %s582_s26 = smov [#allocation2]  }
   0x4   :  { %s36_s25 = sshll.u32 %s581_s24, 4  ;;  %s22_s27 = sshll.u32 %s582_s26, 4  ;;  %s37_s25 = int_to_ptr.vmem [resolvable:$true] %s36_s25  ;;  %s632_s27 = int_to_ptr.vmem [resolvable:$true] %s22_s27 }
   0x5   :  { %s463_s30 = scalar_lea.hbm %s747_s2, 256 }
   0x6   :  { %p464_p0 = scmp.ne.s32.totalorder %s747_s2, %s463_s30  ;;  %p467_p1 = scmp.lt.u32.totalorder %s463_s30, %s747_s2 }
   0x8   :  { %p469_p2 = pnand %p467_p1, %p464_p0 }
   0xa   :  { %472 = shalt.err (!%p469_p2)
}
   0xb   :  { %s473_s12 = scalar_lea.vmem %s37_s25, 256  ;;  %p478_p4 = scmp.lt.s32.totalorder %s37_s25, %s37_s25 }
   0xc   :  { %p474_p3 = scmp.ne.s32.totalorder %s37_s25, %s473_s12  ;;  %p479_p5 = scmp.lt.s32.totalorder %s473_s12, %s473_s12 }
   0xe   :  { %p480_p6 = por %p479_p5, %p478_p4 }
  0x10   :  { %p481_p7 = pnand %p480_p6, %p474_p3 }
  0x12   :  { %484 = shalt.err (!%p481_p7)
}
  0x13   :  { %s583_s13 = smov 64   ;;  %s584_s14 = smov 4  }
  0x14   :  { %42 = dma.hbm_to_vmem [thread:$0]  %s747_s2, 256, %s37_s25, [#allocation6], %s583_s13, %s583_s13, %s584_s14  }
  0x15   :  { %s485_s19 = scalar_lea.hbm %s745_s0, 128 }
  0x16   :  { %p486_p8 = scmp.ne.s32.totalorder %s745_s0, %s485_s19  ;;  %p489_p9 = scmp.lt.u32.totalorder %s485_s19, %s745_s0 }
  0x18   :  { %p491_p10 = pnand %p489_p9, %p486_p8 }
  0x1a   :  { %494 = shalt.err (!%p491_p10)
}
  0x1b   :  { %s495_s24 = scalar_lea.vmem %s632_s27, 128  ;;  %p500_p12 = scmp.lt.s32.totalorder %s632_s27, %s632_s27 }
  0x1c   :  { %p496_p11 = scmp.ne.s32.totalorder %s632_s27, %s495_s24  ;;  %p501_p13 = scmp.lt.s32.totalorder %s495_s24, %s495_s24 }
  0x1e   :  { %p502_p0 = por %p501_p13, %p500_p12 }
  0x20   :  { %p503_p1 = pnand %p502_p0, %p496_p11 }
  0x22   :  { %506 = shalt.err (!%p503_p1)
}
  0x23   :  { %28 = dma.hbm_to_vmem [thread:$0]  %s745_s0, 128, %s632_s27, [#allocation3], %s583_s13, %s583_s13, %s584_s14  }
  0x24   :  { %s585_s26 = smov [#allocation7]   ;;  %s507_s8 = scalar_lea.hbm %s748_s3, 256 }
  0x25   :  { %s48_s28 = sshll.u32 %s585_s26, 4  ;;  %p508_p2 = scmp.ne.s32.totalorder %s748_s3, %s507_s8  ;;  %s49_s28 = int_to_ptr.vmem [resolvable:$true] %s48_s28 }
  0x26   :  { %p511_p3 = scmp.lt.u32.totalorder %s507_s8, %s748_s3 }
  0x28   :  { %p513_p4 = pnand %p511_p3, %p508_p2 }
  0x2a   :  { %516 = shalt.err (!%p513_p4)
}
  0x2b   :  { %s517_s15 = scalar_lea.vmem %s49_s28, 256  ;;  %p522_p6 = scmp.lt.s32.totalorder %s49_s28, %s49_s28 }
  0x2c   :  { %p518_p5 = scmp.ne.s32.totalorder %s49_s28, %s517_s15  ;;  %p523_p7 = scmp.lt.s32.totalorder %s517_s15, %s517_s15 }
  0x2e   :  { %p524_p8 = por %p523_p7, %p522_p6 }
  0x30   :  { %p525_p9 = pnand %p524_p8, %p518_p5 }
  0x32   :  { %528 = shalt.err (!%p525_p9)
}
  0x33   :  { %54 = dma.hbm_to_vmem [thread:$0]  %s748_s3, 256, %s49_s28, [#allocation6], %s583_s13, %s583_s13, %s584_s14  }
  0x34   :  { %573 = dma.done.wait [#allocation3], 128  }
  0x35   :  { %574 = vsyncadd [#allocation3], 4294967168 }
  0x36   :  { %575 = dma.done.wait [#allocation6], 512  }
  0x37   :  { %576 = vsyncadd [#allocation6], 4294966784  ;;  %v586_v0 = vmov 0.0   ;;  %vm587_vm0 = vmmov 0   ;;  %v451_v1 = vld [vmem:[#allocation7] sm:$0xff]   ;;  %v452_v2 = vld [vmem:[#allocation5] sm:$0xff]   ;;  %v201_v9 = vlaneseq }
  0x38   :  { %430 = vmatprep.subr.bf16.mxu1 %v586_v0  ;;  %422 = vmatprep.subr.bf16.mxu0 %v586_v0  ;;  %v453_v3 = vld [vmem:[#allocation7 + $0x8] sm:$0xff]   ;;  %v454_v4 = vld [vmem:[#allocation5 + $0x8] sm:$0xff]   ;;  %vm97_vm1 = vcmask 261120   ;;  %v588_v7 = vmov 1966171168   ;;  %vm270_vm2 = vcmask 1041409  }
  0x39   :  { %434 = vmatprep.mubr.msk.bf16.mxu1 %vm587_vm0, %v586_v0  ;;  %426 = vmatprep.mubr.msk.bf16.mxu0 %vm587_vm0, %v586_v0  ;;  %v684_v5 = vld [vmem:[#allocation2] sm:$0xff]   ;;  %v199_v8 = vunpack.c.l.s4 %v588_v7  ;;  %v692_v11 = vshrl.u32 %v201_v9, 7  ;;  %v261_v38 = vand.u32 127, %v201_v9  ;;  %vm273_vm3 = vcmask 58368  }
  0x3a   :  { %431 = vmatpush3.bf16.msra.mxu1 %v451_v1  ;;  %423 = vmatpush3.bf16.msra.mxu0 %v452_v2  ;;  %v71_v6 = vld [vmem:[%s746_s1] sm:$0x1]  ;;  %v589_v46 = vmov 0   ;;  %v351_v9 = vunpack.c.l.bf16 %v684_v5 }
  0x3b   :  { %432 = vmatprep.subr.bf16.mxu1 %v586_v0  ;;  %424 = vmatprep.subr.bf16.mxu0 %v586_v0  ;;  %v200_v10 = vunpack.c.0.s8 %v199_v8  ;;  %v696_v17 = vsub.s32 0, %v692_v11  ;;  %v414_v27 = vld [vmem:[%s749_s4] ss:$0 sm:$0xff]  ;;  %v264_v40 = vsub.s32 %v261_v38, %v692_v11  ;;  %v284_v47 = vsub.s32 1, %v692_v11  ;;  %s590_s4 = smov [#allocation9]  }
  0x3c   :  { %v415_v32 = vld [vmem:[%s750_s5] ss:$0 sm:$0xff]  ;;  %450 = vset.pattern.permute.xlu0 %v589_v46  ;;  %449 = vset.pattern.permute.xlu1 %v589_v46  ;;  %s393_s5 = sshll.u32 %s590_s4, 4  ;;  %s394_s5 = int_to_ptr.vmem [resolvable:$true] %s393_s5 }
  0x3d   :  { %v203_v12 = vsub.s32 %v200_v10, %v692_v11  ;;  %s529_s18 = scalar_lea.vmem %s394_s5, 32  ;;  %p534_p11 = scmp.lt.s32.totalorder %s394_s5, %s394_s5 }
  0x3e   :  { %433 = vmatpush3.bf16.msra.mxu1 %v453_v3  ;;  %425 = vmatpush3.bf16.msra.mxu0 %v454_v4  ;;  %p530_p10 = scmp.ne.s32.totalorder %s394_s5, %s529_s18  ;;  %p535_p12 = scmp.lt.s32.totalorder %s529_s18, %s529_s18 }
  0x40   :  { %p536_p13 = por %p535_p12, %p534_p11 }
  0x41   :  { %435 = vmatmul.mubr.msk.bf16.vlgmr.msra.gmra.mrb[0].mxu1 %vm97_vm1, %v71_v6  ;;  %427 = vmatmul.mubr.msk.bf16.vlgmr.msra.gmra.mrb[0].mxu0 %vm97_vm1, %v684_v5 }
  0x42   :  { %p537_p0 = pnand %p536_p13, %p530_p10 }
 0x114   :  { %v191_v13 = vpop.f32.mrb[0].mxu1  ;;  %v135_v16 = vpop.f32.mrb[0].mxu0 }
 0x115   :  { %v204_v14 = vrot.slane %v191_v13, %v203_v12  ;;  %v436_v15 = vpop.f32.mrb[1].mxu1  ;;  %v428_v19 = vpop.f32.mrb[1].mxu0 }
 0x116   :  { %v194_v18 = vpop.f32.mrb[2].mxu1  ;;  %v138_v23 = vpop.f32.mrb[2].mxu0 }
 0x117   :  { %v205_v20 = vcombine.high %v204_v14, %v204_v14  ;;  %v212_v21 = vrot.slane %v204_v14, %v203_v12  ;;  %v437_v22 = vpop.f32.mrb[3].mxu1  ;;  %v429_v24 = vpop.f32.mrb[3].mxu0 }
 0x119   :  { %v223_v25 = vrot.slane %v212_v21, %v696_v17  ;;  %v219_v26 = vrot.slane %v205_v20, %v203_v12  ;;  %v352_v12 = vunpack.c.h.bf16 %v684_v5 }
 0x11b   :  { %v230_v28 = vadd.f32 %v223_v25, %v135_v16  ;;  %v227_v29 = vrot.slane %v219_v26, %v696_v17 }
 0x11d   :  { %v231_v30 = vadd.f32 %v227_v29, %v138_v23  ;;  %v239_v31 = vadd.f32 %v414_v27, %v230_v28 }
 0x11f   :  { %v240_v33 = vadd.f32 %v414_v27, %v231_v30  ;;  %v241_v34 = vmax.f32 %v239_v31, 0.0 }
 0x121   :  { %v242_v35 = vmax.f32 %v240_v33, 0.0  ;;  %v250_v36 = vmul.f32 %v415_v32, %v241_v34 }
 0x123   :  { %252 = vadd.xlane.f32.xlu0 %v250_v36  ;;  %v251_v37 = vmul.f32 %v415_v32, %v242_v35 }
 0x127   :  { %254 = vadd.xlane.f32.xlu0 %v251_v37 }
 0x1b0   :  { %v253_v39 = vpop.xlane.xlu0 %252 }
 0x1b1   :  { %v265_v42 = vrot.slane %v253_v39, %v264_v40 }
 0x1b4   :  { %v255_v41 = vpop.xlane.xlu0 %254 }
 0x1b5   :  { %v269_v43 = vrot.slane %v255_v41, %v264_v40 }
 0x1b7   :  { %v271_v44 = vsel %vm270_vm2, %v269_v43, %v265_v42 }
 0x1b8   :  { %v274_v45 = vsel %vm273_vm3, %v271_v44, -inf }
 0x1b9   :  { %275 = vmax.xlane.f32.xlu1 %v274_v45 }
 0x246   :  { %v276_v48 = vpop.xlane.xlu1 %275 }
 0x247   :  { %v281_v49 = vrot.slane %v276_v48, %v696_v17  ;;  %v285_v50 = vrot.slane %v276_v48, %v284_v47 }
 0x249   :  { %v288_v51 = vsub.f32 %v253_v39, %v281_v49  ;;  %v289_v52 = vsub.f32 %v255_v41, %v285_v50 }
 0x24b   :  { %v290_v53 = vmul.f32 1.442695, %v288_v51  ;;  %v292_v54 = vmul.f32 1.442695, %v289_v52 }
 0x24d   :  { %457 = vpow2.f32 %v290_v53 }
 0x24e   :  { %459 = vpow2.f32 %v292_v54 }
 0x257   :  { %v458_v55 = vpop.eup %457 }
 0x258   :  { %v460_v56 = vpop.eup %459  ;;  %297 = vperm.xlu1 %449, %v458_v55  }
 0x259   :  { %300 = vperm.xlu0 %450, %v460_v56  }
 0x2d7   :  { %v298_v57 = vpop.permute.xlu1 %297 }
 0x2d8   :  { %v301_v58 = vpop.permute.xlu0 %300  ;;  %v305_v59 = vrot.slane %v298_v57, %v264_v40 }
 0x2d9   :  { %v309_v60 = vrot.slane %v301_v58, %v264_v40 }
 0x2db   :  { %v310_v61 = vsel %vm270_vm2, %v309_v60, %v305_v59 }
 0x2dc   :  { %v312_v62 = vsel %vm273_vm3, %v310_v61, 0.0 }
 0x2dd   :  { %313 = vadd.xlane.f32.xlu1 %v312_v62 }
 0x36a   :  { %v314_v63 = vpop.xlane.xlu1 %313 }
 0x36b   :  { %461 = vrcp.f32 %v314_v63 }
 0x375   :  { %v462_v0 = vpop.eup %461 }
 0x376   :  { %v316_v1 = vmul.f32 %v462_v0, %v314_v63 }
 0x378   :  { %v317_v2 = vsub.f32 2.0, %v316_v1 }
 0x37a   :  { %v318_v3 = vmul.f32 %v462_v0, %v317_v2 }
 0x37c   :  { %v323_v4 = vrot.slane %v318_v3, %v696_v17  ;;  %v327_v6 = vrot.slane %v318_v3, %v284_v47 }
 0x37e   :  { %v330_v7 = vmul.f32 %v458_v55, %v323_v4  ;;  %v331_v8 = vmul.f32 %v460_v56, %v327_v6 }
 0x380   :  { %335 = vperm.xlu0 %450, %v330_v7  }
 0x384   :  { %338 = vperm.xlu0 %450, %v331_v8  }
 0x3ff   :  { %v336_v10 = vpop.permute.xlu0 %335 }
 0x400   :  { %v355_v11 = vmul.f32 %v351_v9, %v336_v10  ;;  %v343_v16 = vrot.slane %v336_v10, %v264_v40 }
 0x402   :  { %v357_v13 = vsel %vm97_vm1, %v355_v11, 0.0 }
 0x403   :  { %v358_v14 = vrot.slane %v357_v13, 4  ;;  %v339_v15 = vpop.permute.xlu0 %338 }
 0x404   :  { %v347_v18 = vrot.slane %v339_v15, %v264_v40  ;;  %v356_v17 = vmul.f32 %v352_v12, %v339_v15 }
 0x405   :  { %v359_v19 = vadd.f32 %v358_v14, %v357_v13 }
 0x406   :  { %v364_v20 = vsel %vm97_vm1, %v356_v17, 0.0  ;;  %v348_v21 = vsel %vm270_vm2, %v347_v18, %v343_v16 }
 0x407   :  { %v360_v22 = vrot.slane %v359_v19, 2  ;;  %v365_v23 = vrot.slane %v364_v20, 4  ;;  %350 = vst.msk [vmem:[#allocation9] sm:$0x3] %vm273_vm3, %v348_v21 }
 0x408   :  { %540 = shalt.err (!%p537_p0)
}
 0x409   :  { %s541_s21 = scalar_lea.hbm %s752_s7, 32 }
 0x40a   :  { %p542_p1 = scmp.ne.s32.totalorder %s752_s7, %s541_s21  ;;  %p545_p2 = scmp.lt.u32.totalorder %s541_s21, %s752_s7 }
 0x40c   :  { %p547_p3 = pnand %p545_p2, %p542_p1 }
 0x40e   :  { %550 = shalt.err (!%p547_p3)
}
 0x40f   :  { %396 = dma.vmem_to_hbm [thread:$0]  %s394_s5, 32, %s752_s7, [#allocation10]   ;;  %v361_v5 = vadd.f32 %v360_v22, %v359_v19  ;;  %v366_v24 = vadd.f32 %v365_v23, %v364_v20  ;;  %vm375_vm4 = vcmask 254976  }
 0x410   :  { %s591_s28 = smov [#allocation8]  }
 0x411   :  { %v367_v25 = vrot.slane %v366_v24, 2  ;;  %v362_v26 = vrot.slane %v361_v5, 1  ;;  %s383_s29 = sshll.u32 %s591_s28, 4  ;;  %s384_s29 = int_to_ptr.vmem [resolvable:$true] %s383_s29 }
 0x412   :  { %s551_s30 = scalar_lea.vmem %s384_s29, 32  ;;  %p556_p5 = scmp.lt.s32.totalorder %s384_s29, %s384_s29 }
 0x413   :  { %v368_v27 = vadd.f32 %v367_v25, %v366_v24  ;;  %v363_v30 = vadd.f32 %v362_v26, %v361_v5  ;;  %p552_p4 = scmp.ne.s32.totalorder %s384_s29, %s551_s30  ;;  %p557_p6 = scmp.lt.s32.totalorder %s551_s30, %s551_s30 }
 0x415   :  { %v369_v28 = vrot.slane %v368_v27, 1  ;;  %p558_p7 = por %p557_p6, %p556_p5 }
 0x417   :  { %v370_v29 = vadd.f32 %v369_v28, %v368_v27  ;;  %p559_p8 = pnand %p558_p7, %p552_p4 }
 0x419   :  { %v373_v31 = vsel %vm270_vm2, %v370_v29, %v363_v30 }
 0x41a   :  { %376 = vst.msk [vmem:[#allocation8] sm:$0x3] %vm375_vm4, %v373_v31 }
 0x41b   :  { %562 = shalt.err (!%p559_p8)
}
 0x41c   :  { %s563_s9 = scalar_lea.hbm %s751_s6, 32 }
 0x41d   :  { %p564_p9 = scmp.ne.s32.totalorder %s751_s6, %s563_s9  ;;  %p567_p10 = scmp.lt.u32.totalorder %s563_s9, %s751_s6 }
 0x41f   :  { %p569_p11 = pnand %p567_p10, %p564_p9 }
 0x421   :  { %572 = shalt.err (!%p569_p11)
}
 0x422   :  { %386 = dma.vmem_to_hbm [thread:$0]  %s384_s29, 32, %s751_s6, [#allocation4]  }
 0x423   :  { %577 = dma.done.wait [#allocation4], 32  }
 0x424   :  { %578 = vsyncadd [#allocation4], 4294967264 }
 0x425   :  { %579 = dma.done.wait [#allocation10], 32  }
 0x426   :  { %580 = vsyncadd [#allocation10], 4294967264 }
 0x427   :  { %403 = vsyncpa [#allocation3], 1 }
 0x428   :  { %404 = vsyncpa [#allocation6], 1 }
 0x429   :  { %405 = vsyncpa [#allocation4], 1 }
 0x42a   :  { %406 = vsyncpa [#allocation10], 1 }

</bundles_post_ra>
